<compile_context>
chip_gen: v7x
topology: tpu7x:2x2x1
jax: 0.10.0
libtpu: 0.0.40
codegen_flags: <defaults>
</compile_context>

<pallas_src>
import functools

import numpy as np
import jax
import jax.numpy as jnp
from jax.experimental import pallas as pl
from jax.experimental.pallas import tpu as pltpu

CPAD = 128  # channels zero-padded to one full lane tile (lane-dense layout)


# ----------------------------------------------------------------------------
# Adjacency construction (numpy glue; mirrors adj_mx_from_edges without scipy)
# ----------------------------------------------------------------------------
def build_adj_matrix(num_pts, edges):
    n = num_pts * 3
    new_edges = []
    for e in edges:
        for xx in range(e[0] * 3, e[0] * 3 + 3):
            for yy in range(e[1] * 3, e[1] * 3 + 3):
                new_edges.append((xx, yy))
    A = np.zeros((n, n), dtype=np.float32)
    for i, j in new_edges:
        A[i, j] = 1.0
    At = A.T
    gt = (At > A).astype(np.float32)
    A = A + At * gt - A * gt                  # symmetrize (take max)
    A = A + np.eye(n, dtype=np.float32)       # self loops
    rowsum = A.sum(1)
    r_inv = np.where(rowsum > 0, 1.0 / rowsum, 0.0)
    return (r_inv[:, None] * A).astype(np.float32)   # row-normalize


def softmax_masked_adj(A):
    """SemGraphConv: adj = softmax(where(A>0, e, -9e15), dim=1) with learned
    mask e == 1 (its init value).  If trained parameters were loaded, this must
    be recomputed from the trained e."""
    n = A.shape[0]
    logits = np.where(A > 0, 1.0, -9e15).astype(np.float64)
    logits = logits - logits.max(axis=1, keepdims=True)
    ex = np.exp(logits)
    sm = ex / ex.sum(axis=1, keepdims=True)
    adj_diag = np.diag(sm).reshape(n, 1).astype(np.float32)   # adj * I   (diagonal)
    adj_off = (sm * (1.0 - np.eye(n))).astype(np.float32)     # adj * (1 - I)
    return adj_diag, adj_off


# ----------------------------------------------------------------------------
# Pallas kernel: one grid step == one SemGraphConv layer for one batch element
# ----------------------------------------------------------------------------
def _semgcn_layer_kernel(x_ref, w_ref, g_ref, s_ref, diag_ref, adj_ref,
                         o_ref, h_ref, r_ref, *, cpad):
    # x_ref    : (N, Cpad)  f32   padded input coords for this batch element
    # w_ref    : (1, Cpad, 2*Cpad) bf16   this layer's [W0 | W1]
    # g_ref    : (1, 1, Cpad) f32  fused eval-mode BN scale (1.0 on output layer)
    # s_ref    : (1, 1, Cpad) f32  BN shift with bias pre-folded (b*g)
    # diag_ref : (N, 1)  f32      softmax-adj diagonal column
    # adj_ref  : (N, N)  f32      shared off-diagonal adjacency
    # o_ref    : (N, Cpad) f32    output tile (written only on last layer)
    # h_ref/r_ref : VMEM scratch  current activation / residual (persist over l)
    l = pl.program_id(1)
    nl = pl.num_programs(1)

    is_first = l == 0
    is_last = l == nl - 1
    is_odd = (l % 2) == 1
    is_res_start = jnp.logical_and(is_odd, jnp.logical_not(is_last))
    is_res_end = jnp.logical_and(jnp.logical_not(is_odd),
                                 jnp.logical_not(is_first))

    @pl.when(is_first)
    def _():                       # layer 0 reads the (padded) input coords
        h_ref[...] = x_ref[...]

    @pl.when(is_res_start)
    def _():                       # first gconv of a ResGraphConv: save residual
        r_ref[...] = h_ref[...]

    h = h_ref[...]
    # Fused projection: one bf16 MXU pass for both W0 and W1, f32 accumulation.
    hcat = jnp.dot(h.astype(jnp.bfloat16), w_ref[0],
                   preferred_element_type=jnp.float32)
    h0 = hcat[:, :cpad]            # lane-tile-aligned split
    h1 = hcat[:, cpad:]
    # diag(adj) * h0  +  offdiag(adj) @ h1
    y = diag_ref[...] * h0 + jnp.dot(adj_ref[...].astype(jnp.bfloat16),
                                     h1.astype(jnp.bfloat16),
                                     preferred_element_type=jnp.float32)
    # Fused eval-mode BN (bias pre-folded into the shift); f32 VPU epilogue.
    y = y * g_ref[0] + s_ref[0]

    @pl.when(is_last)
    def _():                       # gconv_output (no BN/ReLU) + final `out + x`
        o_ref[...] = y + x_ref[...]

    @pl.when(jnp.logical_and(is_res_end, jnp.logical_not(is_last)))
    def _():                       # second gconv of a ResGraphConv: ReLU + residual
        h_ref[...] = jnp.maximum(y, 0.0) + r_ref[...]

    @pl.when(jnp.logical_and(jnp.logical_not(is_res_end),
                             jnp.logical_not(is_last)))
    def _():                       # gconv_input / first gconv of a block: ReLU
        h_ref[...] = jnp.maximum(y, 0.0)


def semgcn_forward(x, w_all, g_all, s_all, diag_col, adj_off, *, cout):
    B, N, cin = x.shape
    L = w_all.shape[0]
    # Lane-dense, zero-padded input slab.
    x_pad = jnp.zeros((B * N, CPAD), jnp.float32).at[:, :cin].set(
        x.reshape(B * N, cin).astype(jnp.float32))

    flops = int(B * L * (2 * N * CPAD * (2 * CPAD) + 2 * N * N * CPAD))
    bytes_accessed = int(4 * x_pad.size + 2 * w_all.size + 4 * g_all.size
                         + 4 * s_all.size + 4 * diag_col.size
                         + 4 * adj_off.size + 4 * B * N * CPAD)

    kernel = functools.partial(_semgcn_layer_kernel, cpad=CPAD)
    out_pad = pl.pallas_call(
        kernel,
        out_shape=jax.ShapeDtypeStruct((B * N, CPAD), jnp.float32),
        grid_spec=pltpu.PrefetchScalarGridSpec(
            num_scalar_prefetch=0,
            grid=(B, L),                                        # (batch, layer)
            in_specs=[
                pl.BlockSpec((N, CPAD), lambda b, l: (b, 0)),               # x
                pl.BlockSpec((1, CPAD, 2 * CPAD), lambda b, l: (l, 0, 0)),  # W (bf16)
                pl.BlockSpec((1, 1, CPAD), lambda b, l: (l, 0, 0)),         # BN scale
                pl.BlockSpec((1, 1, CPAD), lambda b, l: (l, 0, 0)),         # shift (+bias)
                pl.BlockSpec((N, 1), lambda b, l: (b, 0)),                  # adj diag col
                pl.BlockSpec((N, N), lambda b, l: (0, 0)),                  # shared adj
            ],
            out_specs=pl.BlockSpec((N, CPAD), lambda b, l: (b, 0)),
            scratch_shapes=[pltpu.VMEM((N, CPAD), jnp.float32),   # h
                            pltpu.VMEM((N, CPAD), jnp.float32)],  # residual
        ),
        compiler_params=pltpu.CompilerParams(
            dimension_semantics=("parallel", "arbitrary")),
        cost_estimate=pl.CostEstimate(flops=flops, transcendentals=0,
                                      bytes_accessed=bytes_accessed),
    )(x_pad, w_all, g_all, s_all, diag_col, adj_off)

    # Strip channel padding / unflatten batch outside the kernel (tiny XLA op).
    return out_pad[:, :cout].reshape(B, N, cout)


# ----------------------------------------------------------------------------
# Deterministic parameter initialisation (mirrors SemGraphConv.__init__)
# ----------------------------------------------------------------------------
def init_sem_gconv_params(key, cin, cout):
    k1, k2 = jax.random.split(key)
    # xavier_uniform on W of shape (2, cin, cout), gain=1.414
    fan_in, fan_out = cin * cout, 2 * cout
    bound = 1.414 * np.sqrt(6.0 / (fan_in + fan_out))
    W = jax.random.uniform(k1, (2, cin, cout), jnp.float32, -bound, bound)
    stdv = 1.0 / np.sqrt(cout)
    b = jax.random.uniform(k2, (1, cout), jnp.float32, -stdv, stdv)
    return W[0], W[1], b


# ----------------------------------------------------------------------------
# Full SemGCN forward
# ----------------------------------------------------------------------------
if __name__ == "__main__":
    # Small synthetic graph: 8 skeleton points -> 24 graph nodes (x,y,z split)
    num_pts = 8
    edges = [(i, i + 1) for i in range(num_pts - 1)]
    hid_dim = 32
    # coords_dim=(3,3): the module's final `out + x` requires matching channels
    coords_dim = (3, 3)
    num_layers = 4            # number of _ResGraphConv blocks
    B = 2
    # TODO(synk): p_dropout=None in the module -> dropout is identity and omitted.
    # TODO(synk): BatchNorm1d is implemented in eval mode (running_mean=0,
    # running_var=1, gamma=1, beta=0, eps=1e-5) and fused as a per-channel
    # scale/shift; train-mode batch statistics are not modeled.

    A = build_adj_matrix(num_pts, edges)
    N = A.shape[0]                                       # 24 graph nodes
    adj_diag, adj_off = softmax_masked_adj(A)            # (N,1), (N,N)
    diag_col = np.tile(adj_diag, (B, 1)).astype(np.float32)   # (B*N, 1)

    key = jax.random.PRNGKey(0)
    key, kx = jax.random.split(key)
    x = jax.random.normal(kx, (B, N, coords_dim[0]), jnp.float32)

    # 10 SemGraphConv layers: input, 4 x (gconv1, gconv2), output
    L = 2 * num_layers + 2
    keys = jax.random.split(key, L)
    dims = ([(coords_dim[0], hid_dim)]
            + [(hid_dim, hid_dim)] * (2 * num_layers)
            + [(hid_dim, coords_dim[1])])
    raw = [init_sem_gconv_params(keys[l], cin, cout)
           for l, (cin, cout) in enumerate(dims)]

    bn_scale = np.float32(1.0 / np.sqrt(1.0 + 1e-5))     # eval-mode BN scale

    # Stack + zero-pad layer params into lane-dense slabs; fold bias into shift.
    w_all = np.zeros((L, CPAD, 2 * CPAD), np.float32)
    g_all = np.ones((L, 1, CPAD), np.float32)
    s_all = np.zeros((L, 1, CPAD), np.float32)
    for l, ((cin, cout), (w0, w1, b)) in enumerate(zip(dims, raw)):
        w_all[l, :cin, :cout] = np.asarray(w0)
        w_all[l, :cin, CPAD:CPAD + cout] = np.asarray(w1)
        g = bn_scale if l < L - 1 else np.float32(1.0)   # gconv_output has no BN
        g_all[l, :, :] = g
        s_all[l, 0, :cout] = np.asarray(b)[0] * g        # s' = b*g (+0)

    forward = jax.jit(functools.partial(semgcn_forward, cout=coords_dim[1]))
    out = forward(x,
                  jnp.asarray(w_all, jnp.bfloat16),      # bf16 weights
                  jnp.asarray(g_all), jnp.asarray(s_all),
                  jnp.asarray(diag_col), jnp.asarray(adj_off))
    jax.block_until_ready(out)

    # ------------------------------------------------------------------
    # Pure-JAX reference (unpadded, per-layer, f32 params, default matmul
    # precision == single bf16 MXU pass on TPU, matching the kernel).
    # ------------------------------------------------------------------
    def reference_forward(x):
        ad = jnp.asarray(adj_diag)        # (N, 1)
        ao = jnp.asarray(adj_off)         # (N, N)

        def gconv(h, l):
            w0, w1, b = raw[l]
            h0 = jnp.einsum('bnc,cd->bnd', h, w0)
            h1 = jnp.einsum('bnc,cd->bnd', h, w1)
            return ad * h0 + jnp.einsum('nm,bmd->bnd', ao, h1) + b

        def gc_bn_relu(h, l):
            return jnp.maximum(gconv(h, l) * bn_scale, 0.0)

        h = gc_bn_relu(x, 0)
        for i in range(num_layers):
            r = h
            h = gc_bn_relu(h, 2 * i + 1)
            h = gc_bn_relu(h, 2 * i + 2) + r
        return gconv(h, 2 * num_layers + 1) + x

    ref = jax.jit(reference_forward)(x)
    jax.block_until_ready(ref)
    np.testing.assert_allclose(np.asarray(out), np.asarray(ref),
                               rtol=5e-2, atol=5e-2)

    assert out.shape == (B, N, coords_dim[1]) and out.dtype == jnp.float32
    print("KERNEL_OK")
</pallas_src>

<mosaic_0001>
module attributes {stable_mosaic.version = 11 : i64} {
  func.func @_semgcn_layer_kernel(%arg0: i32, %arg1: i32, %arg2: memref<24x128xf32, #tpu.memory_space<vmem>>, %arg3: memref<1x128x256xbf16, #tpu.memory_space<vmem>>, %arg4: memref<1x1x128xf32, #tpu.memory_space<vmem>>, %arg5: memref<1x1x128xf32, #tpu.memory_space<vmem>>, %arg6: memref<24x1xf32, #tpu.memory_space<vmem>>, %arg7: memref<24x24xf32, #tpu.memory_space<vmem>>, %arg8: memref<24x128xf32, #tpu.memory_space<vmem>>, %arg9: memref<24x128xf32, #tpu.memory_space<vmem>>, %arg10: memref<24x128xf32, #tpu.memory_space<vmem>>) attributes {dimension_semantics = [#tpu.dimension_semantics<parallel>, #tpu.dimension_semantics<arbitrary>], iteration_bounds = array<i64: 2, 10>, scalar_prefetch = 0 : i64, scratch_operands = 2 : i64, tpu.core_type = #tpu.core_type<tc>, window_params = [{transform_indices = @transform_0, window_bounds = array<i64: 24, 128>}, {transform_indices = @transform_1, window_bounds = array<i64: 1, 128, 256>}, {transform_indices = @transform_2, window_bounds = array<i64: 1, 1, 128>}, {transform_indices = @transform_3, window_bounds = array<i64: 1, 1, 128>}, {transform_indices = @transform_4, window_bounds = array<i64: 24, 1>}, {pipeline_mode = #tpu.pipeline_mode<synchronous>, transform_indices = @transform_5, window_bounds = array<i64: 24, 24>}, {transform_indices = @transform_6, window_bounds = array<i64: 24, 128>}]} {
    %c0_i32 = arith.constant 0 : i32
    %0 = arith.cmpi eq, %arg1, %c0_i32 : i32
    %c9_i32 = arith.constant 9 : i32
    %1 = arith.cmpi eq, %arg1, %c9_i32 : i32
    %c2_i32 = arith.constant 2 : i32
    %c0_i32_0 = arith.constant 0 : i32
    %2 = arith.cmpi eq, %c2_i32, %c0_i32_0 : i32
    %c1_i32 = arith.constant 1 : i32
    %3 = arith.select %2, %c1_i32, %c2_i32 : i32
    %4 = arith.remsi %arg1, %3 : i32
    %c0_i32_1 = arith.constant 0 : i32
    %5 = arith.cmpi ne, %4, %c0_i32_1 : i32
    %c0_i32_2 = arith.constant 0 : i32
    %6 = arith.cmpi slt, %4, %c0_i32_2 : i32
    %c0_i32_3 = arith.constant 0 : i32
    %7 = arith.cmpi slt, %3, %c0_i32_3 : i32
    %8 = arith.xori %6, %7 : i1
    %9 = arith.andi %8, %5 : i1
    %10 = arith.addi %4, %3 : i32
    %11 = arith.select %9, %10, %4 : i32
    %c1_i32_4 = arith.constant 1 : i32
    %12 = arith.cmpi eq, %11, %c1_i32_4 : i32
    %true = arith.constant true
    %13 = arith.xori %1, %true : i1
    %14 = arith.andi %12, %13 : i1
    %true_5 = arith.constant true
    %15 = arith.xori %12, %true_5 : i1
    %true_6 = arith.constant true
    %16 = arith.xori %0, %true_6 : i1
    %17 = arith.andi %15, %16 : i1
    %18 = arith.extui %0 : i1 to i32
    %c0_i32_7 = arith.constant 0 : i32
    %19 = arith.cmpi ne, %18, %c0_i32_7 : i32
    scf.if %19 {
      %c0_30 = arith.constant 0 : index
      %c0_31 = arith.constant 0 : index
      %56 = vector.load %arg2[%c0_30, %c0_31] : memref<24x128xf32, #tpu.memory_space<vmem>>, vector<24x128xf32>
      %c0_32 = arith.constant 0 : index
      %c0_33 = arith.constant 0 : index
      %57 = vector.load %arg9[%c0_32, %c0_33] : memref<24x128xf32, #tpu.memory_space<vmem>>, vector<24x128xf32>
      tpu.vector_store %arg9[%c0_32, %c0_33], %56 {strides = array<i32>} : memref<24x128xf32, #tpu.memory_space<vmem>>, vector<24x128xf32>,
    } else {
    }
    %20 = arith.extui %14 : i1 to i32
    %c0_i32_8 = arith.constant 0 : i32
    %21 = arith.cmpi ne, %20, %c0_i32_8 : i32
    scf.if %21 {
      %c0_30 = arith.constant 0 : index
      %c0_31 = arith.constant 0 : index
      %56 = vector.load %arg9[%c0_30, %c0_31] : memref<24x128xf32, #tpu.memory_space<vmem>>, vector<24x128xf32>
      %c0_32 = arith.constant 0 : index
      %c0_33 = arith.constant 0 : index
      %57 = vector.load %arg10[%c0_32, %c0_33] : memref<24x128xf32, #tpu.memory_space<vmem>>, vector<24x128xf32>
      tpu.vector_store %arg10[%c0_32, %c0_33], %56 {strides = array<i32>} : memref<24x128xf32, #tpu.memory_space<vmem>>, vector<24x128xf32>,
    } else {
    }
    %c0 = arith.constant 0 : index
    %c0_9 = arith.constant 0 : index
    %22 = vector.load %arg9[%c0, %c0_9] : memref<24x128xf32, #tpu.memory_space<vmem>>, vector<24x128xf32>
    %23 = arith.truncf %22 : vector<24x128xf32> to vector<24x128xbf16>
    %c0_10 = arith.constant 0 : index
    %c0_11 = arith.constant 0 : index
    %c0_12 = arith.constant 0 : index
    %24 = vector.load %arg3[%c0_10, %c0_11, %c0_12] : memref<1x128x256xbf16, #tpu.memory_space<vmem>>, vector<1x128x256xbf16>
    %25 = vector.shape_cast %24 : vector<1x128x256xbf16> to vector<128x256xbf16>
    %cst = arith.constant dense<0.000000e+00> : vector<24x256xf32>
    %26 = tpu.matmul %23, %25, %cst {dimension_numbers = #tpu.dot_dimension_numbers<[1], [0], [0], [1], [0, 0, 1, 1], [], []>} : vector<24x128xbf16>, vector<128x256xbf16>, vector<24x256xf32> -> vector<24x256xf32>
    %27 = vector.extract_strided_slice %26 {offsets = [0, 0], sizes = [24, 128], strides = [1, 1]} : vector<24x256xf32> to vector<24x128xf32>
    %28 = vector.extract_strided_slice %26 {offsets = [0, 128], sizes = [24, 128], strides = [1, 1]} : vector<24x256xf32> to vector<24x128xf32>
    %c0_13 = arith.constant 0 : index
    %c0_14 = arith.constant 0 : index
    %29 = vector.load %arg6[%c0_13, %c0_14] : memref<24x1xf32, #tpu.memory_space<vmem>>, vector<24x1xf32>
    %30 = vector.broadcast %29 : vector<24x1xf32> to vector<24x128xf32>
    %31 = arith.mulf %30, %27 : vector<24x128xf32>
    %c0_15 = arith.constant 0 : index
    %c0_16 = arith.constant 0 : index
    %32 = vector.load %arg7[%c0_15, %c0_16] : memref<24x24xf32, #tpu.memory_space<vmem>>, vector<24x24xf32>
    %33 = arith.truncf %32 : vector<24x24xf32> to vector<24x24xbf16>
    %34 = arith.truncf %28 : vector<24x128xf32> to vector<24x128xbf16>
    %cst_17 = arith.constant dense<0.000000e+00> : vector<24x128xf32>
    %35 = tpu.matmul %33, %34, %cst_17 {dimension_numbers = #tpu.dot_dimension_numbers<[1], [0], [0], [1], [0, 0, 1, 1], [], []>} : vector<24x24xbf16>, vector<24x128xbf16>, vector<24x128xf32> -> vector<24x128xf32>
    %36 = arith.addf %31, %35 : vector<24x128xf32>
    %c0_18 = arith.constant 0 : index
    %c0_19 = arith.constant 0 : index
    %c0_20 = arith.constant 0 : index
    %37 = vector.load %arg4[%c0_18, %c0_19, %c0_20] : memref<1x1x128xf32, #tpu.memory_space<vmem>>, vector<1x1x128xf32>
    %38 = vector.shape_cast %37 : vector<1x1x128xf32> to vector<1x128xf32>
    %39 = vector.broadcast %38 : vector<1x128xf32> to vector<24x128xf32>
    %40 = arith.mulf %36, %39 : vector<24x128xf32>
    %c0_21 = arith.constant 0 : index
    %c0_22 = arith.constant 0 : index
    %c0_23 = arith.constant 0 : index
    %41 = vector.load %arg5[%c0_21, %c0_22, %c0_23] : memref<1x1x128xf32, #tpu.memory_space<vmem>>, vector<1x1x128xf32>
    %42 = vector.shape_cast %41 : vector<1x1x128xf32> to vector<1x128xf32>
    %43 = vector.broadcast %42 : vector<1x128xf32> to vector<24x128xf32>
    %44 = arith.addf %40, %43 : vector<24x128xf32>
    %45 = arith.extui %1 : i1 to i32
    %c0_i32_24 = arith.constant 0 : i32
    %46 = arith.cmpi ne, %45, %c0_i32_24 : i32
    scf.if %46 {
      %c0_30 = arith.constant 0 : index
      %c0_31 = arith.constant 0 : index
      %56 = vector.load %arg2[%c0_30, %c0_31] : memref<24x128xf32, #tpu.memory_space<vmem>>, vector<24x128xf32>
      %57 = arith.addf %44, %56 : vector<24x128xf32>
      %c0_32 = arith.constant 0 : index
      %c0_33 = arith.constant 0 : index
      %58 = vector.load %arg8[%c0_32, %c0_33] : memref<24x128xf32, #tpu.memory_space<vmem>>, vector<24x128xf32>
      tpu.vector_store %arg8[%c0_32, %c0_33], %57 {strides = array<i32>} : memref<24x128xf32, #tpu.memory_space<vmem>>, vector<24x128xf32>,
    } else {
    }
    %true_25 = arith.constant true
    %47 = arith.xori %1, %true_25 : i1
    %48 = arith.andi %17, %47 : i1
    %49 = arith.extui %48 : i1 to i32
    %c0_i32_26 = arith.constant 0 : i32
    %50 = arith.cmpi ne, %49, %c0_i32_26 : i32
    scf.if %50 {
      %cst_30 = arith.constant 0.000000e+00 : f32
      %56 = vector.broadcast %cst_30 : f32 to vector<24x128xf32>
      %57 = arith.maximumf %44, %56 : vector<24x128xf32>
      %c0_31 = arith.constant 0 : index
      %c0_32 = arith.constant 0 : index
      %58 = vector.load %arg10[%c0_31, %c0_32] : memref<24x128xf32, #tpu.memory_space<vmem>>, vector<24x128xf32>
      %59 = arith.addf %57, %58 : vector<24x128xf32>
      %c0_33 = arith.constant 0 : index
      %c0_34 = arith.constant 0 : index
      %60 = vector.load %arg9[%c0_33, %c0_34] : memref<24x128xf32, #tpu.memory_space<vmem>>, vector<24x128xf32>
      tpu.vector_store %arg9[%c0_33, %c0_34], %59 {strides = array<i32>} : memref<24x128xf32, #tpu.memory_space<vmem>>, vector<24x128xf32>,
    } else {
    }
    %true_27 = arith.constant true
    %51 = arith.xori %17, %true_27 : i1
    %true_28 = arith.constant true
    %52 = arith.xori %1, %true_28 : i1
    %53 = arith.andi %51, %52 : i1
    %54 = arith.extui %53 : i1 to i32
    %c0_i32_29 = arith.constant 0 : i32
    %55 = arith.cmpi ne, %54, %c0_i32_29 : i32
    scf.if %55 {
      %cst_30 = arith.constant 0.000000e+00 : f32
      %56 = vector.broadcast %cst_30 : f32 to vector<24x128xf32>
      %57 = arith.maximumf %44, %56 : vector<24x128xf32>
      %c0_31 = arith.constant 0 : index
      %c0_32 = arith.constant 0 : index
      %58 = vector.load %arg9[%c0_31, %c0_32] : memref<24x128xf32, #tpu.memory_space<vmem>>, vector<24x128xf32>
      tpu.vector_store %arg9[%c0_31, %c0_32], %57 {strides = array<i32>} : memref<24x128xf32, #tpu.memory_space<vmem>>, vector<24x128xf32>,
    } else {
    }
    return
  }
  func.func @transform_0(%arg0: i32, %arg1: i32) -> (i32, i32) {
    %c0_i32 = arith.constant 0 : i32
    %c0_i32_0 = arith.constant 0 : i32
    return %arg0, %c0_i32 : i32, i32
  }
  func.func @transform_1(%arg0: i32, %arg1: i32) -> (i32, i32, i32) {
    %c0_i32 = arith.constant 0 : i32
    %c0_i32_0 = arith.constant 0 : i32
    %c0_i32_1 = arith.constant 0 : i32
    return %arg1, %c0_i32, %c0_i32_0 : i32, i32, i32
  }
  func.func @transform_2(%arg0: i32, %arg1: i32) -> (i32, i32, i32) {
    %c0_i32 = arith.constant 0 : i32
    %c0_i32_0 = arith.constant 0 : i32
    %c0_i32_1 = arith.constant 0 : i32
    return %arg1, %c0_i32, %c0_i32_0 : i32, i32, i32
  }
  func.func @transform_3(%arg0: i32, %arg1: i32) -> (i32, i32, i32) {
    %c0_i32 = arith.constant 0 : i32
    %c0_i32_0 = arith.constant 0 : i32
    %c0_i32_1 = arith.constant 0 : i32
    return %arg1, %c0_i32, %c0_i32_0 : i32, i32, i32
  }
  func.func @transform_4(%arg0: i32, %arg1: i32) -> (i32, i32) {
    %c0_i32 = arith.constant 0 : i32
    %c0_i32_0 = arith.constant 0 : i32
    return %arg0, %c0_i32 : i32, i32
  }
  func.func @transform_5(%arg0: i32, %arg1: i32) -> (i32, i32) {
    %c0_i32 = arith.constant 0 : i32
    %c0_i32_0 = arith.constant 0 : i32
    %c0_i32_1 = arith.constant 0 : i32
    return %c0_i32, %c0_i32_0 : i32, i32
  }
  func.func @transform_6(%arg0: i32, %arg1: i32) -> (i32, i32) {
    %c0_i32 = arith.constant 0 : i32
    %c0_i32_0 = arith.constant 0 : i32
    return %arg0, %c0_i32 : i32, i32
  }
}

</mosaic_0001>

<bundles_post_ra>
// kernel: semgcn_forward.1
= control target key start
LH: loop header
LB: loop body
LE: loop exit
PB: predicated region body
PF: predicated region fallthrough
CT: control target
= control target key end

     0   :  { %s1353_s0 = inlined_call_operand.vmem [shape: f32[48,128], index: 0, kind: input, shape index: {}]   ;;  %s1354_s1 = inlined_call_operand.hbm [shape: bf16[10,128,256], index: 1, kind: input, shape index: {}]   ;;  %s1355_s2 = inlined_call_operand.vmem [shape: f32[10,1,128], index: 2, kind: input, shape index: {}]   ;;  %s1356_s3 = inlined_call_operand.vmem [shape: f32[10,1,128], index: 3, kind: input, shape index: {}]   ;;  %s1357_s4 = inlined_call_operand.vmem [shape: f32[48,1], index: 4, kind: input, shape index: {}]   ;;  %s1358_s5 = inlined_call_operand.vmem [shape: f32[24,24], index: 5, kind: input, shape index: {}]   ;;  %s1359_s6 = inlined_call_operand.vmem [shape: f32[48,128], index: 6, kind: output, shape index: {}]  }
   0x1   :  { %1362 = sst [smem:[#allocation10_spill]] %s1354_s1 }
   0x2   :  { %11 = vsyncpa [#allocation5], 0 }
   0x3   :  { %13 = vsyncpa [#allocation5 + $0x1], 0  ;;  %s1109_s21 = smov 0   ;;  %s1111_s22 = smov 0  }
   0x4   :  { %s1113_s23 = smov 0   ;;  %s1115_s24 = smov 0  }
   0x5   :  { %s1117_s25 = smov 0   ;;  %s1119_s26 = smov 0  }
   0x6   :  { %s1121_s27 = smov 0   ;;  %s1123_s28 = smov 0  }
   0x7 LB: > { %1363 = sst [smem:[#allocation7_spill]] %s1064_s27  ;;  %s819_s29 = sadd.s32 4294967295, %s1068_s28   ;;  %s1068_s28 = sphi %s1123_s28, %s19_s28   ;;  %s1064_s27 = sphi %s1121_s27, %s1373_s27   ;;  %s1060_s26 = sphi %s1119_s26, %s1378_s26   ;;  %s1056_s25 = sphi %s1117_s25, %s1371_s25   ;;  %s1052_s24 = sphi %s1115_s24, %s1377_s24   ;;  %s1048_s23 = sphi %s1113_s23, %s1376_s23   ;;  %s1044_s22 = sphi %s1111_s22, %s1375_s22   ;;  %s1040_s21 = sphi %s1109_s21, %s1374_s21  }
   0x8   : > { %s28_s30 = sadd.s32 1, %s1060_s26  ;;  %s31_s7 = sadd.s32 1, %s1064_s27 }
   0x9   : > { %p29_p0 = scmp.ge.s32.totalorder %s28_s30, 10  ;;  %s64_s8 = sadd.s32 1, %s1048_s23 }
   0xa   : > { %p71_p1 = scmp.ne.s32.totalorder %s1048_s23, %s1044_s22  ;;  %p72_p2 = scmp.eq.s32.totalorder %s1068_s28, 0 }
   0xb   : > { %s1380_s30 = smov (%p29_p0, %s28_s30), 0  ;;  %s1382_s7 = smov (!%p29_p0, %s31_s7), %s1064_s27 }
   0xc   : > { %1364 = sst [smem:[#allocation8_spill]] %s1380_s30  ;;  %s61_s9 = ssub.s32 %s1060_s26, %s1380_s30 }
   0xd   : > { %p33_p3 = scmp.ge.s32.totalorder %s1382_s7, 2  ;;  %p62_p4 = scmp.eq.s32.totalorder %s61_s9, 0 }
   0xe   : > { %p1159_p5 = por %p72_p2, %p71_p1  ;;  %p77_p6 = scmp.ne.s32.totalorder %s1044_s22, %s1040_s21 }
   0xf   : > { %s1384_s7 = smov (%p33_p3, %s1382_s7), 0  ;;  %p78_p7 = scmp.eq.s32.totalorder %s819_s29, 0 }
  0x10   : > { %1366 = sst [smem:[#allocation9_spill]] %s1384_s7  ;;  %p878_p8 = scmp.lt.s32.totalorder %s1068_s28, 20 }
  0x11   : > { %s1167_s11 = scalar_select %p62_p4, %s1048_s23, %s64_s8  }
  0x12   : > { %s238_s12 = sand.u32 1, %s1048_s23   ;;  %p1171_p9 = por %p78_p7, %p77_p6 }
  0x13   : > { %s823_s14 = sshll.u32 %s238_s12, 7  ;;  %s858_s15 = sshll.u32 %s1060_s26, 11 }
  0x14   : > { %s1368_s1 = sld [smem:[#allocation10_spill]]  ;;  %s242_s19 = scalar_lea.vmem [#allocation4], %s823_s14 }
  0x15   : > { %s249_s20 = sshll.u32 %s242_s19, 4  ;;  %p1183_p10 = pnand %p878_p8, %p1159_p5  ;;  %s1187_s20 = int_to_ptr.vmem [resolvable:$true] %s249_s20 }
  0x16   : > { %s1189_s29 = scalar_lea.sflag [#allocation5], %s238_s12 }
  0x17   : > { %p974_p12 = pneg %p1183_p10 }
  0x1a   : > { %s1179_s18 = scalar_lea.hbm %s1368_s1, %s858_s15  ;;  %s977_s14 = scalar_lea.hbm %s1368_s1, 20480 }
  0x1b   : > { %s972_s8 = scalar_lea.hbm %s1179_s18, 2048  ;;  %p978_p1 = scmp.lt.u32.totalorder %s1179_s18, %s1368_s1 }
  0x1c   : > { %p973_p11 = scmp.ne.s32.totalorder %s1179_s18, %s972_s8  ;;  %p979_p2 = scmp.lt.u32.totalorder %s977_s14, %s972_s8 }
  0x1d   : > { %p981_p4 = scmp.lt.u32.totalorder %s972_s8, %s1179_s18 }
  0x1e   : > { %p975_p13 = pnand %p974_p12, %p973_p11  ;;  %p980_p3 = por %p979_p2, %p978_p1 }
  0x20   : > { %p976_p0 = pneg %p975_p13  ;;  %p982_p5 = por %p981_p4, %p980_p3 }
  0x22   : > { %p983_p6 = pnand %p982_p5, %p976_p0 }
  0x24   : > { %986 = shalt.err (!%p983_p6)
}
  0x25   : > { %s987_s12 = scalar_lea.vmem %s1187_s20, 2048  ;;  %s1070_s17 = smov [#allocation4]  }
  0x26   : > { %p988_p7 = scmp.ne.s32.totalorder %s1187_s20, %s987_s12  ;;  %s992_s19 = sshll.u32 %s1070_s17, 4  ;;  %s993_s19 = int_to_ptr.vmem [resolvable:$false] %s992_s19 }
  0x27   : > { %s994_s9 = scalar_lea.vmem %s993_s19, 4096  ;;  %p995_p13 = scmp.lt.s32.totalorder %s1187_s20, %s993_s19 }
  0x28   : > { %p990_p8 = pnand %p988_p7, %p974_p12  ;;  %p996_p1 = scmp.lt.s32.totalorder %s994_s9, %s987_s12 }
  0x2a   : > { %p991_p11 = pneg %p990_p8  ;;  %p997_p2 = por %p996_p1, %p995_p13 }
  0x2c   : > { %p998_p3 = pnand %p997_p2, %p991_p11 }
  0x2e   : > { %1001 = shalt.err (!%p998_p3)
}
  0x2f   : > { %s1071_s8 = smov 128   ;;  %s1072_s10 = smov 8  }
  0x30   : > { %877 = dma.hbm_to_vmem [thread:$0]  (!%p1183_p10), %s1179_s18, 2048, %s1187_s20, %s1189_s29, %s1071_s8, %s1071_s8, %s1072_s10  }
  0x31   : > { %p826_p12 = scmp.ge.s32.totalorder %s1068_s28, 1  ;;  %p278_p0 = scmp.lt.s32.totalorder %s1068_s28, 21 }
  0x33   : > { %p279_p4 = pnand %p826_p12, %p278_p0 }
  0x34   : > { %s284_s14 = sand.u32 (!%p279_p4), 1, %s1044_s22  }
  0x35   : > { %282 = sbr.rel (%p279_p4) target bundleno = 591 (0x24f), region = 44  ;;  %s827_s15 = sshll.u32 (!%p279_p4), %s284_s14, 7 }
  0x36   : > { %s285_s16 = scalar_lea.sflag (!%p279_p4), [#allocation5], %s284_s14  ;;  %s1220_s12 = scalar_lea.vmem (!%p279_p4), [#allocation4], %s827_s15 }
  0x3c   : > { %1035 = dma.done.wait (%p1171_p9), %s285_s16, 2048  }
  0x3d   : > { %1037 = vsyncadd (%p1171_p9), %s285_s16, 4294965248  ;;  %s333_s18 = smul.u32 3, %s1056_s25  ;;  %p339_p10 = scmp.lt.s32.totalorder %s1052_s24, 9 }
  0x3e   : > { %p360_p5 = scmp.lt.s32.totalorder %s1052_s24, 0  ;;  %s361_s20 = ssub.s32 0, %s1052_s24 }
  0x3f   : > { %p334_p6 = scmp.lt.s32.totalorder %s333_s18, 5  ;;  %s831_s21 = smin.u32 %s1052_s24, %s361_s20 }
  0x40   : > { %s1232_s29 = scalar_select %p339_p10, %s1052_s24, 9 }
  0x41   : > { %s1386_s18 = smov (!%p334_p6, %s333_s18), 5  ;;  %s363_s14 = sand.u32 1, %s831_s21  }
  0x42   : > { %s341_s19 = scalar_lea.vmem %s1355_s2, %s1232_s29  ;;  %s344_s25 = scalar_lea.vmem %s1356_s3, %s1232_s29 }
  0x43   : > { %s828_s10 = sshll.u32 %s1386_s18, 3  ;;  %s364_s9 = ssub.s32 0, %s363_s14 }
  0x44   : > { %s1245_s20 = scalar_lea.vmem %s1353_s0, %s828_s10  ;;  %s1250_s30 = scalar_lea.vmem %s1357_s4, %s828_s10 }
  0x45   : > { %s1255_s17 = scalar_lea.vmem %s1359_s6, %s828_s10  ;;  %s1388_s9 = smov (!%p360_p5, %s364_s9), %s363_s14 }
  0x46   : > { %p833_p9 = scmp.lt.s32.totalorder %s1388_s9, 0  ;;  %s370_s18 = sadd.s32 2, %s1388_s9 }
  0x47   : > { %p373_p7 = scmp.ne.s32.totalorder %s1052_s24, 9  ;;  %p377_p8 = scmp.ne.s32.totalorder %s1052_s24, 0 }
  0x48   : > { %s1390_s18 = smov (!%p833_p9, %s370_s18), %s1388_s9  ;;  %v383_v0 = vld [vmem:[%s1245_s20] sm:$0xff] (!%p377_p8)  ;;  %v384_v1 = vld [vmem:[%s1245_s20 + $0x8] sm:$0xff] (!%p377_p8)  ;;  %v385_v2 = vld [vmem:[%s1245_s20 + $0x10] sm:$0xff] (!%p377_p8) }
  0x49   : > { %p372_p11 = scmp.eq.s32.totalorder %s1390_s18, 1  ;;  %p376_p13 = scmp.ne.s32.totalorder %s1390_s18, 1  ;;  %386 = vst [vmem:[#allocation2] sm:$0xff] (!%p377_p8), %v383_v0  ;;  %387 = vst [vmem:[#allocation2 + $0x8] sm:$0xff] (!%p377_p8), %v384_v1 }
  0x4a   : > { %382 = sbr.rel (%p377_p8) target bundleno = 81 (0x51), region = 52  ;;  %388 = vst [vmem:[#allocation2 + $0x10] sm:$0xff] (!%p377_p8), %v385_v2 }
  0x4b   : > { %p374_p1 = pnand %p373_p7, %p372_p11  ;;  %p1263_p2 = pnand %p377_p8, %p376_p13 }
  0x4d   : > { %p379_p3 = pneg %p1263_p2 }
  0x51 PF: > { %390 = sbr.rel (%p374_p1) target bundleno = 88 (0x58), region = 56  ;;  %v391_v3 = vld [vmem:[#allocation2] sm:$0xff] (!%p374_p1)  ;;  %v392_v4 = vld [vmem:[#allocation2 + $0x8] sm:$0xff] (!%p374_p1)  ;;  %v393_v5 = vld [vmem:[#allocation2 + $0x10] sm:$0xff] (!%p374_p1) }
  0x52   : > { %394 = vst [vmem:[#allocation3] sm:$0xff] (!%p374_p1), %v391_v3  ;;  %395 = vst [vmem:[#allocation3 + $0x8] sm:$0xff] (!%p374_p1), %v392_v4 }
  0x53   : > { %396 = vst [vmem:[#allocation3 + $0x10] sm:$0xff] (!%p374_p1), %v393_v5 }
  0x58 PF: > { %v948_v6 = vld [vmem:[%s1220_s12 + $0x4] ss:$8 sps:$4 sm:$0xff]   ;;  %v950_v7 = vld [vmem:[%s1220_s12] ss:$8 sps:$4 sm:$0xff]   ;;  %v1073_v8 = vmov 0   ;;  %v549_v15 = vld [vmem:[%s1250_s30] sm:$0xff] }
  0x59   : > { %530 = vmatprep.mubr.bf16.mxu0 %v1073_v8  ;;  %946 = vset.pattern.permute.xlu0 %v1073_v8  ;;  %v951_v9 = vld [vmem:[%s1220_s12 + $0x14] ss:$8 sps:$4 sm:$0xff]   ;;  %v953_v10 = vld [vmem:[%s1220_s12 + $0x10] ss:$8 sps:$4 sm:$0xff]   ;;  %v954_v11 = vld [vmem:[%s1220_s12 + $0x24] ss:$8 sps:$4 sm:$0xff]  }
  0x5a   : > { %498 = vmatprep.subr.bf16.mxu0 %v948_v6  ;;  %947 = vset.pattern.permute.xlu1 %v1073_v8  ;;  %v956_v12 = vld [vmem:[%s1220_s12 + $0x20] ss:$8 sps:$4 sm:$0xff]   ;;  %v957_v13 = vld [vmem:[%s1220_s12 + $0x34] ss:$8 sps:$4 sm:$0xff]   ;;  %v959_v14 = vld [vmem:[%s1220_s12 + $0x30] ss:$8 sps:$4 sm:$0xff]  }
  0x5b   : > { %499 = vmatpush1.bf16.msra.mxu0 %v950_v7  ;;  %v960_v16 = vld [vmem:[%s1220_s12 + $0x44] ss:$8 sps:$4 sm:$0xff]   ;;  %554 = vperm.xlu0 %946, %v549_v15   ;;  %v550_v18 = vld [vmem:[%s1250_s30 + $0x8] sm:$0xff]  ;;  %v962_v19 = vld [vmem:[%s1220_s12 + $0x40] ss:$8 sps:$4 sm:$0xff]   ;;  %vm577_vm0 = vcmask 195584  }
  0x5c   : > { %500 = vmatprep.subr.bf16.mxu0 %v951_v9  ;;  %v551_v17 = vld [vmem:[%s1250_s30 + $0x10] sm:$0xff]  ;;  %v963_v20 = vld [vmem:[%s1220_s12 + $0x54] ss:$8 sps:$4 sm:$0xff]   ;;  %v965_v21 = vld [vmem:[%s1220_s12 + $0x50] ss:$8 sps:$4 sm:$0xff]   ;;  %vm584_vm1 = vcmask 1043456  }
  0x5d   : > { %564 = vperm.xlu1 %947, %v551_v17   ;;  %v966_v22 = vld [vmem:[%s1220_s12 + $0x64] ss:$8 sps:$4 sm:$0xff]   ;;  %v968_v23 = vld [vmem:[%s1220_s12 + $0x60] ss:$8 sps:$4 sm:$0xff]   ;;  %v969_v24 = vld [vmem:[%s1220_s12 + $0x74] ss:$8 sps:$4 sm:$0xff]  }
  0x5e   : > { %v971_v25 = vld [vmem:[%s1220_s12 + $0x70] ss:$8 sps:$4 sm:$0xff]   ;;  %v399_v29 = vld [vmem:[#allocation2 + $0x10] sm:$0xff] }
  0x5f   : > { %501 = vmatpush1.bf16.msra.mxu0 %v953_v10  ;;  %559 = vperm.xlu0 %946, %v550_v18   ;;  %v397_v26 = vld [vmem:[#allocation2] sm:$0xff]  ;;  %v398_v27 = vld [vmem:[#allocation2 + $0x8] sm:$0xff]  ;;  %v401_v30 = vpack.c.bf16 %v399_v29, %v399_v29  ;;  %v572_v41 = vld [vmem:[%s1358_s5 + $0x10] sm:$0xff] }
  0x60   : > { %502 = vmatprep.subr.bf16.mxu0 %v954_v11  ;;  %v400_v28 = vpack.c.bf16 %v398_v27, %v397_v26  ;;  %v570_v31 = vld [vmem:[%s1358_s5] sm:$0xff]  ;;  %v571_v32 = vld [vmem:[%s1358_s5 + $0x8] sm:$0xff]  ;;  %v574_v46 = vpack.c.bf16 %v572_v41, %v572_v41  ;;  %v664_v6 = vld [vmem:[%s1245_s20 + $0x10] sm:$0xff] (!%p373_p7) }
  0x61   : > { %v573_v33 = vpack.c.bf16 %v571_v32, %v570_v31  ;;  %v853_v53 = vld [vmem:[%s341_s19] ss:$0 sm:$0xff]  ;;  %v663_v5 = vld [vmem:[%s1245_s20 + $0x8] sm:$0xff] (!%p373_p7) }
  0x62   : > { %v854_v57 = vld [vmem:[%s344_s25] ss:$0 sm:$0xff] }
  0x63   : > { %503 = vmatpush1.bf16.msra.mxu0 %v956_v12  ;;  %867 = vmatprep.mubr.msk.bf16.mxu1 %vm577_vm0, %v573_v33  ;;  %v662_v4 = vld [vmem:[%s1245_s20] sm:$0xff] (!%p373_p7) }
  0x64   : > { %504 = vmatprep.subr.bf16.mxu0 %v957_v13 }
  0x67   : > { %505 = vmatpush1.bf16.msra.mxu0 %v959_v14 }
  0x68   : > { %506 = vmatprep.subr.bf16.mxu0 %v960_v16 }
  0x6b   : > { %507 = vmatpush1.bf16.msra.mxu0 %v962_v19 }
  0x6c   : > { %508 = vmatprep.subr.bf16.mxu0 %v963_v20 }
  0x6f   : > { %509 = vmatpush1.bf16.msra.mxu0 %v965_v21 }
  0x70   : > { %510 = vmatprep.subr.bf16.mxu0 %v966_v22 }
  0x73   : > { %511 = vmatpush1.bf16.msra.mxu0 %v968_v23 }
  0x74   : > { %512 = vmatprep.subr.bf16.mxu0 %v969_v24 }
  0x77   : > { %513 = vmatpush1.bf16.msra.mxu0 %v971_v25 }
  0x7a   : > { %531 = vmatmul.mubr.bf16.vlgmr.msra.gmra.mrb[0].mxu0 %v400_v28 }
  0x7b   : > { %540 = vmatprep.mubr.bf16.mxu0 %v1073_v8 }
  0x82   : > { %541 = vmatmul.mubr.bf16.gmra.mrb[4].mxu0 %v401_v30 }
  0xda   : > { %v555_v47 = vpop.permute.xlu0 %554 }
  0xdc   : > { %v565_v48 = vpop.permute.xlu1 %564 }
  0xde   : > { %v560_v49 = vpop.permute.xlu0 %559 }
 0x14d   : > { %v532_v34 = vpop.f32.mrb[0].mxu0 }
 0x14e   : > { %v534_v35 = vpop.f32.mrb[1].mxu0  ;;  %v567_v51 = vmul.f32 %v555_v47, %v532_v34 }
 0x14f   : > { %v536_v36 = vpop.f32.mrb[2].mxu0 }
 0x150   : > { %v538_v37 = vpop.f32.mrb[3].mxu0  ;;  %v568_v56 = vmul.f32 %v560_v49, %v536_v36 }
 0x151   : > { %v575_v38 = vpack.c.bf16 %v538_v37, %v534_v35 }
 0x153   : > { %863 = vmatprep.subr.bf16.mxu1 %v575_v38 }
 0x154   : > { %864 = vmatpush3.bf16.msra.mxu1 %v575_v38 }
 0x155   : > { %v542_v39 = vpop.f32.mrb[4].mxu0 }
 0x156   : > { %v544_v40 = vpop.f32.mrb[5].mxu0  ;;  %v569_v50 = vmul.f32 %v565_v48, %v542_v39 }
 0x157   : > { %v576_v42 = vpack.c.bf16 %v544_v40, %v544_v40  ;;  %v546_v43 = vpop.f32.mrb[6].mxu0 }
 0x158   : > { %v547_v44 = vpop.f32.mrb[7].mxu0 }
 0x159   : > { %871 = vmatprep.subr.msk.bf16.mxu1 %vm584_vm1, %v576_v42  ;;  %v586_v45 = vsel %vm584_vm1, %v576_v42, 0 }
 0x15a   : > { %866 = vmatpush3.bf16.msra.mxu1 %v586_v45 }
 0x15d   : > { %868 = vmatmul.mubr.msk.bf16.vlgmr.msra.gmra.mrb[0].mxu1 %vm577_vm0, %v574_v46 }
 0x230   : > { %v869_v52 = vpop.f32.mrb[0].mxu1 }
 0x231   : > { %v638_v54 = vadd.f32 %v869_v52, %v569_v50  ;;  %v622_v55 = vpop.f32.mrb[1].mxu1 }
 0x232   : > { %v636_v58 = vadd.f32 %v622_v55, %v567_v51  ;;  %v870_v59 = vpop.f32.mrb[2].mxu1  ;;  %661 = sbr.rel (%p373_p7) target bundleno = 573 (0x23d), region = 60 }
 0x233   : > { %v648_v60 = vmul.f32 %v853_v53, %v638_v54  ;;  %v625_v61 = vpop.f32.mrb[3].mxu1 }
 0x234   : > { %v646_v62 = vmul.f32 %v853_v53, %v636_v58  ;;  %v637_v63 = vadd.f32 %v625_v61, %v568_v56 }
 0x235   : > { %v658_v0 = vadd.f32 %v854_v57, %v648_v60 }
 0x236   : > { %v656_v1 = vadd.f32 %v854_v57, %v646_v62  ;;  %v647_v2 = vmul.f32 %v853_v53, %v637_v63 }
 0x237   : > { %v667_v9 = vadd.f32 (!%p373_p7), %v664_v6, %v658_v0 }
 0x238   : > { %v657_v3 = vadd.f32 %v854_v57, %v647_v2  ;;  %v665_v7 = vadd.f32 (!%p373_p7), %v662_v4, %v656_v1 }
 0x239   : > { %670 = vst [vmem:[%s1255_s17 + $0x10] sm:$0xff] %v667_v9 }
 0x23a   : > { %v666_v8 = vadd.f32 %v663_v5, %v657_v3  ;;  %668 = vst [vmem:[%s1255_s17] sm:$0xff] %v665_v7 }
 0x23c   : > { %669 = vst [vmem:[%s1255_s17 + $0x8] sm:$0xff] %v666_v8 }
 0x23d PF: > { %p671_p12 = pnand %p379_p3, %p373_p7 }
 0x23e   : > { %v675_v10 = vmax.f32 (!%p671_p12), %v656_v1, 0.0  ;;  %v678_v11 = vld [vmem:[#allocation3] sm:$0xff] (!%p671_p12)  ;;  %v676_v12 = vmax.f32 (!%p671_p12), %v657_v3, 0.0  ;;  %v679_v13 = vld [vmem:[#allocation3 + $0x8] sm:$0xff] (!%p671_p12)  ;;  %v677_v14 = vmax.f32 (!%p671_p12), %v658_v0, 0.0  ;;  %v680_v15 = vld [vmem:[#allocation3 + $0x10] sm:$0xff] (!%p671_p12) }
 0x23f   : > { %674 = sbr.rel (%p671_p12) target bundleno = 582 (0x246), region = 64 }
 0x240   : > { %v681_v16 = vadd.f32 (!%p671_p12), %v678_v11, %v675_v10  ;;  %v682_v17 = vadd.f32 (!%p671_p12), %v679_v13, %v676_v12  ;;  %v683_v18 = vadd.f32 (!%p671_p12), %v680_v15, %v677_v14 }
 0x242   : > { %684 = vst [vmem:[#allocation2] sm:$0xff] (!%p671_p12), %v681_v16  ;;  %685 = vst [vmem:[#allocation2 + $0x8] sm:$0xff] (!%p671_p12), %v682_v17 }
 0x243   : > { %686 = vst [vmem:[#allocation2 + $0x10] sm:$0xff] (!%p671_p12), %v683_v18 }
 0x246 PF: > { %p688_p0 = pnand %p1263_p2, %p373_p7 }
 0x247   : > { %v692_v19 = vmax.f32 (!%p688_p0), %v656_v1, 0.0  ;;  %v693_v20 = vmax.f32 (!%p688_p0), %v657_v3, 0.0  ;;  %v694_v21 = vmax.f32 (!%p688_p0), %v658_v0, 0.0 }
 0x248   : > { %691 = sbr.rel (%p688_p0) target bundleno = 591 (0x24f), region = 68 }
 0x249   : > { %695 = vst [vmem:[#allocation2] sm:$0xff] (!%p688_p0), %v692_v19  ;;  %696 = vst [vmem:[#allocation2 + $0x8] sm:$0xff] (!%p688_p0), %v693_v20 }
 0x24a   : > { %697 = vst [vmem:[#allocation2 + $0x10] sm:$0xff] (!%p688_p0), %v694_v21 }
 0x24f PF: > { %s19_s28 = sadd.s32 1, %s1068_s28   ;;  %s1371_s25 = sld [smem:[#allocation7_spill]] }
 0x250   : > { %p16_p4 = scmp.ge.s32.totalorder %s19_s28, 22   ;;  %s1372_s29 = sld [smem:[#allocation8_spill]] }
 0x251   : > { %s1373_s27 = sld [smem:[#allocation9_spill]]  ;;  %s1374_s21 = smov %s1044_s22 }
 0x252   : > { %s1375_s22 = smov %s1048_s23  ;;  %s1376_s23 = smov %s1167_s11 }
 0x253   : > { %s1377_s24 = smov %s1060_s26  ;;  %18 = sbr.rel (!%p16_p4) target bundleno = 7 (0x7), region = 116 }
 0x256   : > { %s1378_s26 = smov %s1372_s29 }
 0x25a   :  { %720 = vsyncpa [#allocation5], 1 }
 0x25b   :  { %722 = vsyncpa [#allocation5 + $0x1], 1 }

</bundles_post_ra>
